<compile_context>
chip_gen: v6e
topology: v6e:2x2x1
jax: 0.10.0
libtpu: 0.0.40
codegen_flags: <defaults>
</compile_context>

<pallas_src>
import math

import jax
import jax.numpy as jnp
from jax.experimental import pallas as pl
from jax.experimental.pallas import tpu as pltpu


def lastnet_kernel(h_ref, w0_ref, b0_ref, w1_ref, b1_ref, w2_ref, b2_ref,
                   o_ref):
    # Layer 0: relu -> (dropout: identity in eval) -> linear
    x = jnp.maximum(h_ref[...], 0.0)
    x = jnp.dot(x, w0_ref[...], preferred_element_type=jnp.float32) + b0_ref[...]
    # Layer 1: relu -> (dropout: identity) -> linear
    x = jnp.maximum(x, 0.0)
    x = jnp.dot(x, w1_ref[...], preferred_element_type=jnp.float32) + b1_ref[...]
    # Last layer: relu -> (dropout: identity) -> linear
    x = jnp.maximum(x, 0.0)
    x = jnp.dot(x, w2_ref[...], preferred_element_type=jnp.float32) + b2_ref[...]
    o_ref[...] = x.astype(o_ref.dtype)


def _round_up(x, m):
    return ((x + m - 1) // m) * m


def _pad2d(a, rows, cols):
    return jnp.pad(a, ((0, rows - a.shape[0]), (0, cols - a.shape[1])))


def lastnet_forward(H, params, *, block_rows=2048):
    """Fused LastNet forward.  H: (B, d_in) f32.  params: 3x (W (in,out), b (out,))."""
    (w0, b0), (w1, b1), (w2, b2) = params
    B, d_in = H.shape
    assert w0.shape[0] == d_in
    d_out = w2.shape[1]

    # --- Pad only the weight OUTPUT (lane) dims to 128; the H input width is
    # left untouched so streamed input bytes are not inflated.  Layer input
    # widths are kept consistent with the previous layer's padded width.
    # Zero-padded columns/rows and zero bias entries are exact.
    d0_p = _round_up(w0.shape[1], 128)
    d1_p = _round_up(w1.shape[1], 128)
    d2_p = _round_up(d_out, 128)

    w0p = _pad2d(w0, d_in, d0_p)                 # (d_in, d0_p)   -- no K pad
    w1p = _pad2d(w1, d0_p, d1_p)                 # (d0_p, d1_p)
    w2p = _pad2d(w2, d1_p, d2_p)                 # (d1_p, d2_p)
    b0p = _pad2d(b0.reshape(1, -1), 1, d0_p)     # (1, N): broadcasts over rows
    b1p = _pad2d(b1.reshape(1, -1), 1, d1_p)
    b2p = _pad2d(b2.reshape(1, -1), 1, d2_p)

    # --- Row tile: multiple of 8; for large B clamp so there are >= 2 grid
    # steps (lets the "parallel" axis shard across TensorCores on v7x).
    # No batch padding: grid = cdiv(B, tb), Pallas clips the ragged last tile.
    tb = max(8, min(block_rows, _round_up(pl.cdiv(B, 2), 8)))
    grid = (pl.cdiv(B, tb),)

    def row_spec(shape):
        return pl.BlockSpec(shape, lambda i: (i, 0))

    def const_spec(a):
        # Same block every grid step -> stays VMEM-resident (fetched once).
        return pl.BlockSpec(a.shape, lambda i: (0, 0))

    out_p = pl.pallas_call(
        lastnet_kernel,
        out_shape=jax.ShapeDtypeStruct((B, d2_p), jnp.float32),
        grid=grid,
        in_specs=[
            row_spec((tb, d_in)),                  # H tiles stream, natural width
            const_spec(w0p), const_spec(b0p),      # weights/biases resident
            const_spec(w1p), const_spec(b1p),
            const_spec(w2p), const_spec(b2p),
        ],
        out_specs=row_spec((tb, d2_p)),            # lane-dense output stores
        compiler_params=pltpu.CompilerParams(
            dimension_semantics=("parallel",),     # megacore / v7x 2-TC
        ),
    )(H, w0p, b0p, w1p, b1p, w2p, b2p)

    return out_p[:, :d_out]


def xavier_uniform(key, fan_in, fan_out, gain=1.0):
    # torch.nn.init.xavier_uniform_ with gain = calculate_gain('sigmoid') == 1.0
    bound = gain * math.sqrt(6.0 / (fan_in + fan_out))
    # stored as (in, out) so the kernel computes x @ W
    return jax.random.uniform(key, (fan_in, fan_out), jnp.float32,
                              minval=-bound, maxval=bound)


def make_params(key, dims):
    # dims = [hidden_sizes[-1]+extra, last_hidden_sizes..., output_size]
    params = []
    for i in range(len(dims) - 1):
        key, sub = jax.random.split(key)
        w = xavier_uniform(sub, dims[i], dims[i + 1])
        b = jnp.full((dims[i + 1],), 0.1, jnp.float32)   # bias.data.fill_(0.1)
        params.append((w, b))
    return params


def _reference(H, params):
    ref = H
    for (w, b) in params:
        ref = jnp.maximum(ref, 0.0) @ w + b
    return ref


if __name__ == "__main__":
    # Synthetic config: conf.hidden_sizes[-1]=32, extra_input_size=0,
    # last_hidden_sizes=[64, 48], output_size=16, last_non_linearity='relu'.
    # TODO(synk): nn.Dropout is identity in eval mode; training-mode dropout not implemented.
    dims = [32, 64, 48, 16]
    key = jax.random.PRNGKey(0)
    key, hk1, hk2 = jax.random.split(key, 3)
    params = make_params(key, dims)

    # --- Small case (B=8): single grid step.
    H_small = jax.random.normal(hk1, (8, dims[0]), jnp.float32)
    out_small = lastnet_forward(H_small, params)
    jax.block_until_ready(out_small)
    ref_small = _reference(H_small, params)
    assert out_small.shape == ref_small.shape
    assert jnp.allclose(out_small, ref_small, atol=1e-5, rtol=1e-5), \
        "mismatch vs reference (small batch)"

    # --- Larger case (B=1000), default tile: 2 grid steps, ragged last tile.
    H_big = jax.random.normal(hk2, (1000, dims[0]), jnp.float32)
    out_big = lastnet_forward(H_big, params)
    jax.block_until_ready(out_big)
    ref_big = _reference(H_big, params)
    assert out_big.shape == ref_big.shape
    assert jnp.allclose(out_big, ref_big, atol=1e-5, rtol=1e-5), \
        "mismatch vs reference (large batch, default tile)"

    # --- Same batch with a small tile (256): 4 grid steps, partial edge tile,
    # weights VMEM-resident across steps.
    out_big2 = lastnet_forward(H_big, params, block_rows=256)
    jax.block_until_ready(out_big2)
    assert jnp.allclose(out_big2, ref_big, atol=1e-5, rtol=1e-5), \
        "mismatch vs reference (large batch, small tile)"

    print("KERNEL_OK")
</pallas_src>

<mosaic_0001>
module attributes {stable_mosaic.version = 11 : i64} {
  func.func @lastnet_kernel(%arg0: i32, %arg1: memref<8x32xf32, #tpu.memory_space<vmem>>, %arg2: memref<32x128xf32, #tpu.memory_space<vmem>>, %arg3: memref<1x128xf32, #tpu.memory_space<vmem>>, %arg4: memref<128x128xf32, #tpu.memory_space<vmem>>, %arg5: memref<1x128xf32, #tpu.memory_space<vmem>>, %arg6: memref<128x128xf32, #tpu.memory_space<vmem>>, %arg7: memref<1x128xf32, #tpu.memory_space<vmem>>, %arg8: memref<8x128xf32, #tpu.memory_space<vmem>>) attributes {dimension_semantics = [#tpu.dimension_semantics<parallel>], iteration_bounds = array<i64: 1>, scalar_prefetch = 0 : i64, scratch_operands = 0 : i64, tpu.core_type = #tpu.core_type<tc>, window_params = [{transform_indices = @transform_0, window_bounds = array<i64: 8, 32>}, {pipeline_mode = #tpu.pipeline_mode<synchronous>, transform_indices = @transform_1, window_bounds = array<i64: 32, 128>}, {pipeline_mode = #tpu.pipeline_mode<synchronous>, transform_indices = @transform_2, window_bounds = array<i64: 1, 128>}, {pipeline_mode = #tpu.pipeline_mode<synchronous>, transform_indices = @transform_3, window_bounds = array<i64: 128, 128>}, {pipeline_mode = #tpu.pipeline_mode<synchronous>, transform_indices = @transform_4, window_bounds = array<i64: 1, 128>}, {pipeline_mode = #tpu.pipeline_mode<synchronous>, transform_indices = @transform_5, window_bounds = array<i64: 128, 128>}, {pipeline_mode = #tpu.pipeline_mode<synchronous>, transform_indices = @transform_6, window_bounds = array<i64: 1, 128>}, {transform_indices = @transform_7, window_bounds = array<i64: 8, 128>}]} {
    %c0 = arith.constant 0 : index
    %c0_0 = arith.constant 0 : index
    %0 = vector.load %arg1[%c0, %c0_0] : memref<8x32xf32, #tpu.memory_space<vmem>>, vector<8x32xf32>
    %cst = arith.constant 0.000000e+00 : f32
    %1 = vector.broadcast %cst : f32 to vector<8x32xf32>
    %2 = arith.maximumf %0, %1 : vector<8x32xf32>
    %c0_1 = arith.constant 0 : index
    %c0_2 = arith.constant 0 : index
    %3 = vector.load %arg2[%c0_1, %c0_2] : memref<32x128xf32, #tpu.memory_space<vmem>>, vector<32x128xf32>
    %cst_3 = arith.constant dense<0.000000e+00> : vector<8x128xf32>
    %4 = tpu.matmul %2, %3, %cst_3 {dimension_numbers = #tpu.dot_dimension_numbers<[1], [0], [0], [1], [0, 0, 1, 1], [], []>} : vector<8x32xf32>, vector<32x128xf32>, vector<8x128xf32> -> vector<8x128xf32>
    %c0_4 = arith.constant 0 : index
    %c0_5 = arith.constant 0 : index
    %5 = vector.load %arg3[%c0_4, %c0_5] : memref<1x128xf32, #tpu.memory_space<vmem>>, vector<1x128xf32>
    %6 = vector.broadcast %5 : vector<1x128xf32> to vector<8x128xf32>
    %7 = arith.addf %4, %6 : vector<8x128xf32>
    %cst_6 = arith.constant 0.000000e+00 : f32
    %8 = vector.broadcast %cst_6 : f32 to vector<8x128xf32>
    %9 = arith.maximumf %7, %8 : vector<8x128xf32>
    %c0_7 = arith.constant 0 : index
    %c0_8 = arith.constant 0 : index
    %10 = vector.load %arg4[%c0_7, %c0_8] : memref<128x128xf32, #tpu.memory_space<vmem>>, vector<128x128xf32>
    %cst_9 = arith.constant dense<0.000000e+00> : vector<8x128xf32>
    %11 = tpu.matmul %9, %10, %cst_9 {dimension_numbers = #tpu.dot_dimension_numbers<[1], [0], [0], [1], [0, 0, 1, 1], [], []>} : vector<8x128xf32>, vector<128x128xf32>, vector<8x128xf32> -> vector<8x128xf32>
    %c0_10 = arith.constant 0 : index
    %c0_11 = arith.constant 0 : index
    %12 = vector.load %arg5[%c0_10, %c0_11] : memref<1x128xf32, #tpu.memory_space<vmem>>, vector<1x128xf32>
    %13 = vector.broadcast %12 : vector<1x128xf32> to vector<8x128xf32>
    %14 = arith.addf %11, %13 : vector<8x128xf32>
    %cst_12 = arith.constant 0.000000e+00 : f32
    %15 = vector.broadcast %cst_12 : f32 to vector<8x128xf32>
    %16 = arith.maximumf %14, %15 : vector<8x128xf32>
    %c0_13 = arith.constant 0 : index
    %c0_14 = arith.constant 0 : index
    %17 = vector.load %arg6[%c0_13, %c0_14] : memref<128x128xf32, #tpu.memory_space<vmem>>, vector<128x128xf32>
    %cst_15 = arith.constant dense<0.000000e+00> : vector<8x128xf32>
    %18 = tpu.matmul %16, %17, %cst_15 {dimension_numbers = #tpu.dot_dimension_numbers<[1], [0], [0], [1], [0, 0, 1, 1], [], []>} : vector<8x128xf32>, vector<128x128xf32>, vector<8x128xf32> -> vector<8x128xf32>
    %c0_16 = arith.constant 0 : index
    %c0_17 = arith.constant 0 : index
    %19 = vector.load %arg7[%c0_16, %c0_17] : memref<1x128xf32, #tpu.memory_space<vmem>>, vector<1x128xf32>
    %20 = vector.broadcast %19 : vector<1x128xf32> to vector<8x128xf32>
    %21 = arith.addf %18, %20 : vector<8x128xf32>
    %c0_18 = arith.constant 0 : index
    %c0_19 = arith.constant 0 : index
    %22 = vector.load %arg8[%c0_18, %c0_19] : memref<8x128xf32, #tpu.memory_space<vmem>>, vector<8x128xf32>
    tpu.vector_store %arg8[%c0_18, %c0_19], %21 {strides = array<i32>} : memref<8x128xf32, #tpu.memory_space<vmem>>, vector<8x128xf32>,
    return
  }
  func.func @transform_0(%arg0: i32) -> (i32, i32) {
    %c0_i32 = arith.constant 0 : i32
    %c0_i32_0 = arith.constant 0 : i32
    return %arg0, %c0_i32 : i32, i32
  }
  func.func @transform_1(%arg0: i32) -> (i32, i32) {
    %c0_i32 = arith.constant 0 : i32
    %c0_i32_0 = arith.constant 0 : i32
    %c0_i32_1 = arith.constant 0 : i32
    return %c0_i32, %c0_i32_0 : i32, i32
  }
  func.func @transform_2(%arg0: i32) -> (i32, i32) {
    %c0_i32 = arith.constant 0 : i32
    %c0_i32_0 = arith.constant 0 : i32
    %c0_i32_1 = arith.constant 0 : i32
    return %c0_i32, %c0_i32_0 : i32, i32
  }
  func.func @transform_3(%arg0: i32) -> (i32, i32) {
    %c0_i32 = arith.constant 0 : i32
    %c0_i32_0 = arith.constant 0 : i32
    %c0_i32_1 = arith.constant 0 : i32
    return %c0_i32, %c0_i32_0 : i32, i32
  }
  func.func @transform_4(%arg0: i32) -> (i32, i32) {
    %c0_i32 = arith.constant 0 : i32
    %c0_i32_0 = arith.constant 0 : i32
    %c0_i32_1 = arith.constant 0 : i32
    return %c0_i32, %c0_i32_0 : i32, i32
  }
  func.func @transform_5(%arg0: i32) -> (i32, i32) {
    %c0_i32 = arith.constant 0 : i32
    %c0_i32_0 = arith.constant 0 : i32
    %c0_i32_1 = arith.constant 0 : i32
    return %c0_i32, %c0_i32_0 : i32, i32
  }
  func.func @transform_6(%arg0: i32) -> (i32, i32) {
    %c0_i32 = arith.constant 0 : i32
    %c0_i32_0 = arith.constant 0 : i32
    %c0_i32_1 = arith.constant 0 : i32
    return %c0_i32, %c0_i32_0 : i32, i32
  }
  func.func @transform_7(%arg0: i32) -> (i32, i32) {
    %c0_i32 = arith.constant 0 : i32
    %c0_i32_0 = arith.constant 0 : i32
    return %arg0, %c0_i32 : i32, i32
  }
}

</mosaic_0001>

<bundles_post_ra>
// kernel: tpu_custom_call.1
= control target key start
LH: loop header
LB: loop body
LE: loop exit
PB: predicated region body
PF: predicated region fallthrough
CT: control target
= control target key end

     0   :  { %12 = vsyncpa [#allocation3], 0  ;;  %s738_s0 = inlined_call_operand.hbm [shape: f32[8,32], index: 0, kind: input, shape index: {}]   ;;  %s739_s1 = inlined_call_operand.hbm [shape: f32[32,128], index: 1, kind: input, shape index: {}]   ;;  %s740_s2 = inlined_call_operand.vmem [shape: f32[1,128], index: 2, kind: input, shape index: {}]   ;;  %s741_s3 = inlined_call_operand.hbm [shape: f32[128,128], index: 3, kind: input, shape index: {}]   ;;  %s742_s4 = inlined_call_operand.vmem [shape: f32[1,128], index: 4, kind: input, shape index: {}]   ;;  %s743_s5 = inlined_call_operand.hbm [shape: f32[128,128], index: 5, kind: input, shape index: {}]   ;;  %s744_s6 = inlined_call_operand.vmem [shape: f32[1,128], index: 6, kind: input, shape index: {}]   ;;  %s745_s7 = inlined_call_operand.hbm [shape: f32[8,128], index: 7, kind: output, shape index: {}]  }
   0x1   :  { %13 = vsyncpa [#allocation6], 0 }
   0x2   :  { %14 = vsyncpa [#allocation9], 0 }
   0x3   :  { %15 = vsyncpa [#allocation4], 0  ;;  %s614_s24 = smov [#allocation5]  }
   0x4   :  { %s31_s25 = sshll.u32 %s614_s24, 4  ;;  %s32_s25 = int_to_ptr.vmem [resolvable:$true] %s31_s25 }
   0x5   :  { %s514_s26 = scalar_lea.vmem %s32_s25, 512  ;;  %p519_p1 = scmp.lt.s32.totalorder %s32_s25, %s32_s25 }
   0x6   :  { %p515_p0 = scmp.ne.s32.totalorder %s32_s25, %s514_s26  ;;  %p520_p2 = scmp.lt.s32.totalorder %s514_s26, %s514_s26 }
   0x8   :  { %p521_p3 = por %p520_p2, %p519_p1 }
   0xa   :  { %p522_p4 = pnand %p521_p3, %p515_p0 }
   0xc   :  { %525 = shalt.err (!%p522_p4)
}
   0xd   :  { %s615_s27 = smov 128   ;;  %s616_s28 = smov 8  }
   0xe   :  { %37 = dma.hbm_to_vmem [thread:$0]  %s739_s1, 512, %s32_s25, [#allocation6], %s615_s27, %s615_s27, %s616_s28  }
   0xf   :  { %s617_s8 = smov [#allocation2]   ;;  %s618_s10 = smov [#allocation7]  }
  0x10   :  { %s22_s9 = sshll.u32 %s617_s8, 4  ;;  %s45_s11 = sshll.u32 %s618_s10, 4  ;;  %s23_s9 = int_to_ptr.vmem [resolvable:$true] %s22_s9  ;;  %s46_s11 = int_to_ptr.vmem [resolvable:$true] %s45_s11 }
  0x11   :  { %s534_s12 = scalar_lea.vmem %s23_s9, 128  ;;  %p539_p6 = scmp.lt.s32.totalorder %s23_s9, %s23_s9 }
  0x12   :  { %p535_p5 = scmp.ne.s32.totalorder %s23_s9, %s534_s12  ;;  %p540_p7 = scmp.lt.s32.totalorder %s534_s12, %s534_s12 }
  0x14   :  { %p541_p8 = por %p540_p7, %p539_p6 }
  0x16   :  { %p542_p9 = pnand %p541_p8, %p535_p5 }
  0x18   :  { %545 = shalt.err (!%p542_p9)
}
  0x19   :  { %25 = dma.hbm_to_vmem [thread:$0]  %s738_s0, 128, %s23_s9, [#allocation3]  }
  0x1a   :  { %s554_s15 = scalar_lea.vmem %s46_s11, 2048  ;;  %p559_p11 = scmp.lt.s32.totalorder %s46_s11, %s46_s11 }
  0x1b   :  { %p555_p10 = scmp.ne.s32.totalorder %s46_s11, %s554_s15  ;;  %p560_p12 = scmp.lt.s32.totalorder %s554_s15, %s554_s15 }
  0x1d   :  { %p561_p13 = por %p560_p12, %p559_p11 }
  0x1f   :  { %p562_p0 = pnand %p561_p13, %p555_p10 }
  0x21   :  { %565 = shalt.err (!%p562_p0)
}
  0x22   :  { %51 = dma.hbm_to_vmem [thread:$0]  %s741_s3, 2048, %s46_s11, [#allocation6], %s615_s27, %s615_s27, %s616_s28  }
  0x23   :  { %s619_s17 = smov [#allocation8]  }
  0x24   :  { %s59_s18 = sshll.u32 %s619_s17, 4  ;;  %s60_s18 = int_to_ptr.vmem [resolvable:$true] %s59_s18 }
  0x25   :  { %s574_s19 = scalar_lea.vmem %s60_s18, 2048  ;;  %p579_p2 = scmp.lt.s32.totalorder %s60_s18, %s60_s18 }
  0x26   :  { %p575_p1 = scmp.ne.s32.totalorder %s60_s18, %s574_s19  ;;  %p580_p3 = scmp.lt.s32.totalorder %s574_s19, %s574_s19 }
  0x28   :  { %p581_p4 = por %p580_p3, %p579_p2 }
  0x2a   :  { %p582_p5 = pnand %p581_p4, %p575_p1 }
  0x2c   :  { %585 = shalt.err (!%p582_p5)
}
  0x2d   :  { %65 = dma.hbm_to_vmem [thread:$0]  %s743_s5, 2048, %s60_s18, [#allocation9], %s615_s27, %s615_s27, %s616_s28  }
  0x2e   :  { %606 = dma.done.wait [#allocation3], 128  }
  0x2f   :  { %607 = vsyncadd [#allocation3], 4294967168 }
  0x30   :  { %608 = dma.done.wait [#allocation6], 2560  }
  0x31   :  { %609 = vsyncadd [#allocation6], 4294964736 }
  0x32   :  { %610 = dma.done.wait [#allocation9], 2048  }
  0x33   :  { %611 = vsyncadd [#allocation9], 4294965248  ;;  %v620_v0 = vmov 0.0   ;;  %vm621_vm0 = vmmov 0   ;;  %v85_v1 = vld [vmem:[#allocation5 + $0x18] sm:$0xff]  ;;  %v84_v2 = vld [vmem:[#allocation5 + $0x10] sm:$0xff] }
  0x34   :  { %416 = vmatprep.subr.mxu0 %v620_v0  ;;  %424 = vmatprep.mubr.msk.f32.mxu0 %vm621_vm0, %v620_v0  ;;  %v80_v3 = vld [vmem:[#allocation2] sm:$0xff]  ;;  %v83_v5 = vld [vmem:[#allocation5 + $0x8] sm:$0xff]  ;;  %v182_v6 = vld [vmem:[#allocation7 + $0x70] sm:$0xff]  ;;  %vm93_vm1 = vcmask 261120   ;;  %s622_s24 = smov [#allocation10]  }
  0x35   :  { %427 = vmatprep.subr.mxu1 %v620_v0  ;;  %459 = vmatprep.mubr.msk.f32.mxu1 %vm621_vm0, %v620_v0  ;;  %v183_v4 = vld [vmem:[#allocation7 + $0x78] sm:$0xff]  ;;  %v181_v7 = vld [vmem:[#allocation7 + $0x68] sm:$0xff]  ;;  %v82_v8 = vld [vmem:[#allocation5] sm:$0xff]  ;;  %v81_v9 = vmax.f32 %v80_v3, 0.0  ;;  %s362_s25 = sshll.u32 %s622_s24, 4  ;;  %s363_s25 = int_to_ptr.vmem [resolvable:$true] %s362_s25 }
  0x36   :  { %417 = vmatpush3.msra.mxu0 %v85_v1  ;;  %428 = vmatpush3.msra.mxu1 %v183_v4  ;;  %v180_v10 = vld [vmem:[#allocation7 + $0x60] sm:$0xff]  ;;  %v179_v11 = vld [vmem:[#allocation7 + $0x58] sm:$0xff]  ;;  %v178_v12 = vld [vmem:[#allocation7 + $0x50] sm:$0xff]  ;;  %s586_s26 = scalar_lea.vmem %s363_s25, 128  ;;  %p591_p7 = scmp.lt.s32.totalorder %s363_s25, %s363_s25 }
  0x37   :  { %418 = vmatprep.subr.mxu0 %v620_v0  ;;  %429 = vmatprep.subr.mxu1 %v620_v0  ;;  %v177_v13 = vld [vmem:[#allocation7 + $0x48] sm:$0xff]  ;;  %v176_v14 = vld [vmem:[#allocation7 + $0x40] sm:$0xff]  ;;  %v175_v15 = vld [vmem:[#allocation7 + $0x38] sm:$0xff]  ;;  %p587_p6 = scmp.ne.s32.totalorder %s363_s25, %s586_s26  ;;  %p592_p8 = scmp.lt.s32.totalorder %s586_s26, %s586_s26 }
  0x38   :  { %419 = vmatpush3.msra.mxu0 %v84_v2  ;;  %430 = vmatpush3.msra.mxu1 %v182_v6  ;;  %v174_v16 = vld [vmem:[#allocation7 + $0x30] sm:$0xff]  ;;  %v173_v17 = vld [vmem:[#allocation7 + $0x28] sm:$0xff]  ;;  %v172_v18 = vld [vmem:[#allocation7 + $0x20] sm:$0xff] }
  0x39   :  { %420 = vmatprep.subr.mxu0 %v620_v0  ;;  %431 = vmatprep.subr.mxu1 %v620_v0  ;;  %v171_v19 = vld [vmem:[#allocation7 + $0x18] sm:$0xff]  ;;  %v170_v20 = vld [vmem:[#allocation7 + $0x10] sm:$0xff]  ;;  %v169_v21 = vld [vmem:[#allocation7 + $0x8] sm:$0xff]  ;;  %p593_p9 = por %p592_p8, %p591_p7 }
  0x3a   :  { %421 = vmatpush3.msra.mxu0 %v83_v5  ;;  %432 = vmatpush3.msra.mxu1 %v181_v7  ;;  %v168_v22 = vld [vmem:[#allocation7] sm:$0xff]  ;;  %v277_v23 = vld [vmem:[#allocation8 + $0x78] sm:$0xff]  ;;  %v276_v24 = vld [vmem:[#allocation8 + $0x70] sm:$0xff] }
  0x3b   :  { %422 = vmatprep.subr.mxu0 %v620_v0  ;;  %433 = vmatprep.subr.mxu1 %v620_v0  ;;  %v275_v25 = vld [vmem:[#allocation8 + $0x68] sm:$0xff]  ;;  %v274_v26 = vld [vmem:[#allocation8 + $0x60] sm:$0xff]  ;;  %v273_v27 = vld [vmem:[#allocation8 + $0x58] sm:$0xff]  ;;  %p594_p10 = pnand %p593_p9, %p587_p6 }
  0x3c   :  { %423 = vmatpush3.msra.mxu0 %v82_v8  ;;  %434 = vmatpush3.msra.mxu1 %v180_v10  ;;  %v272_v28 = vld [vmem:[#allocation8 + $0x50] sm:$0xff]  ;;  %v271_v29 = vld [vmem:[#allocation8 + $0x48] sm:$0xff]  ;;  %v270_v30 = vld [vmem:[#allocation8 + $0x40] sm:$0xff] }
  0x3d   :  { %425 = vmatmul.mubr.msk.f32.vlgmr.msra.gmra.mxu0 %vm93_vm1, %v81_v9  ;;  %435 = vmatprep.subr.mxu1 %v620_v0  ;;  %v269_v31 = vld [vmem:[#allocation8 + $0x38] sm:$0xff]  ;;  %v268_v32 = vld [vmem:[#allocation8 + $0x30] sm:$0xff]  ;;  %v267_v33 = vld [vmem:[#allocation8 + $0x28] sm:$0xff] }
  0x3e   :  { %462 = vmatprep.subr.mxu0 %v620_v0  ;;  %436 = vmatpush3.msra.mxu1 %v179_v11  ;;  %v266_v34 = vld [vmem:[#allocation8 + $0x20] sm:$0xff]  ;;  %v265_v35 = vld [vmem:[#allocation8 + $0x18] sm:$0xff]  ;;  %v264_v41 = vld [vmem:[#allocation8 + $0x10] sm:$0xff] }
  0x3f   :  { %494 = vmatprep.mubr.msk.f32.mxu0 %vm621_vm0, %v620_v0  ;;  %437 = vmatprep.subr.mxu1 %v620_v0  ;;  %v373_v36 = vld [vmem:[%s740_s2] ss:$0 sm:$0xff]  ;;  %v263_v42 = vld [vmem:[#allocation8 + $0x8] sm:$0xff]  ;;  %v262_v43 = vld [vmem:[#allocation8] sm:$0xff] }
  0x40   :  { %438 = vmatpush3.msra.mxu1 %v178_v12  ;;  %463 = vmatpush3.msra.mxu0 %v277_v23  ;;  %v375_v44 = vld [vmem:[%s742_s4] ss:$0 sm:$0xff] }
  0x41   :  { %439 = vmatprep.subr.mxu1 %v620_v0  ;;  %464 = vmatprep.subr.mxu0 %v620_v0  ;;  %v376_v49 = vld [vmem:[%s744_s6] ss:$0 sm:$0xff] }
  0x42   :  { %440 = vmatpush3.msra.mxu1 %v177_v13  ;;  %465 = vmatpush3.msra.mxu0 %v276_v24 }
  0x43   :  { %441 = vmatprep.subr.mxu1 %v620_v0  ;;  %466 = vmatprep.subr.mxu0 %v620_v0 }
  0x44   :  { %442 = vmatpush3.msra.mxu1 %v176_v14  ;;  %467 = vmatpush3.msra.mxu0 %v275_v25 }
  0x45   :  { %443 = vmatprep.subr.mxu1 %v620_v0  ;;  %468 = vmatprep.subr.mxu0 %v620_v0 }
  0x46   :  { %444 = vmatpush3.msra.mxu1 %v175_v15  ;;  %469 = vmatpush3.msra.mxu0 %v274_v26 }
  0x47   :  { %445 = vmatprep.subr.mxu1 %v620_v0  ;;  %470 = vmatprep.subr.mxu0 %v620_v0 }
  0x48   :  { %446 = vmatpush3.msra.mxu1 %v174_v16  ;;  %471 = vmatpush3.msra.mxu0 %v273_v27 }
  0x49   :  { %447 = vmatprep.subr.mxu1 %v620_v0  ;;  %472 = vmatprep.subr.mxu0 %v620_v0 }
  0x4a   :  { %448 = vmatpush3.msra.mxu1 %v173_v17  ;;  %473 = vmatpush3.msra.mxu0 %v272_v28 }
  0x4b   :  { %449 = vmatprep.subr.mxu1 %v620_v0  ;;  %474 = vmatprep.subr.mxu0 %v620_v0 }
  0x4c   :  { %450 = vmatpush3.msra.mxu1 %v172_v18  ;;  %475 = vmatpush3.msra.mxu0 %v271_v29 }
  0x4d   :  { %451 = vmatprep.subr.mxu1 %v620_v0  ;;  %476 = vmatprep.subr.mxu0 %v620_v0 }
  0x4e   :  { %452 = vmatpush3.msra.mxu1 %v171_v19  ;;  %477 = vmatpush3.msra.mxu0 %v270_v30 }
  0x4f   :  { %453 = vmatprep.subr.mxu1 %v620_v0  ;;  %478 = vmatprep.subr.mxu0 %v620_v0 }
  0x50   :  { %454 = vmatpush3.msra.mxu1 %v170_v20  ;;  %479 = vmatpush3.msra.mxu0 %v269_v31 }
  0x51   :  { %455 = vmatprep.subr.mxu1 %v620_v0  ;;  %480 = vmatprep.subr.mxu0 %v620_v0 }
  0x52   :  { %456 = vmatpush3.msra.mxu1 %v169_v21  ;;  %481 = vmatpush3.msra.mxu0 %v268_v32 }
  0x53   :  { %457 = vmatprep.subr.mxu1 %v620_v0  ;;  %482 = vmatprep.subr.mxu0 %v620_v0 }
  0x54   :  { %458 = vmatpush3.msra.mxu1 %v168_v22  ;;  %483 = vmatpush3.msra.mxu0 %v267_v33 }
  0x55   :  { %484 = vmatprep.subr.mxu0 %v620_v0 }
  0x56   :  { %485 = vmatpush3.msra.mxu0 %v266_v34 }
  0x57   :  { %486 = vmatprep.subr.mxu0 %v620_v0 }
  0x58   :  { %487 = vmatpush3.msra.mxu0 %v265_v35 }
  0x59   :  { %488 = vmatprep.subr.mxu0 %v620_v0 }
  0x5a   :  { %489 = vmatpush3.msra.mxu0 %v264_v41 }
  0x5b   :  { %490 = vmatprep.subr.mxu0 %v620_v0 }
  0x5c   :  { %491 = vmatpush3.msra.mxu0 %v263_v42 }
  0x5d   :  { %492 = vmatprep.subr.mxu0 %v620_v0 }
  0x5e   :  { %493 = vmatpush3.msra.mxu0 %v262_v43 }
  0xfd   :  { %v163_v37 = vpop.f32.mrf.mxu0 }
  0xfe   :  { %v164_v38 = vadd.f32 %v373_v36, %v163_v37 }
  0xff   :  { %v426_v39 = vpop.f32.mrf.mxu0 }
 0x100   :  { %v167_v40 = vmax.f32 %v164_v38, 0.0 }
 0x102   :  { %460 = vmatmul.mubr.f32.vlgmr.msra.gmra.mxu1 %v167_v40 }
 0x1c2   :  { %v257_v45 = vpop.f32.mrf.mxu1 }
 0x1c3   :  { %v258_v46 = vadd.f32 %v375_v44, %v257_v45 }
 0x1c4   :  { %v461_v47 = vpop.f32.mrf.mxu1 }
 0x1c5   :  { %v261_v48 = vmax.f32 %v258_v46, 0.0 }
 0x1c7   :  { %495 = vmatmul.mubr.f32.vlgmr.msra.gmra.mxu0 %v261_v48 }
 0x287   :  { %v351_v50 = vpop.f32.mrf.mxu0 }
 0x288   :  { %v352_v51 = vadd.f32 %v376_v49, %v351_v50 }
 0x289   :  { %v496_v52 = vpop.f32.mrf.mxu0 }
 0x28a   :  { %355 = vst [vmem:[#allocation10] sm:$0xff] %v352_v51 }
 0x28b   :  { %597 = shalt.err (!%p594_p10)
}
 0x28c   :  { %365 = dma.vmem_to_hbm [thread:$0]  %s363_s25, 128, %s745_s7, [#allocation4]  }
 0x28d   :  { %612 = dma.done.wait [#allocation4], 128  }
 0x28e   :  { %613 = vsyncadd [#allocation4], 4294967168 }
 0x28f   :  { %369 = vsyncpa [#allocation3], 1 }
 0x290   :  { %370 = vsyncpa [#allocation6], 1 }
 0x291   :  { %371 = vsyncpa [#allocation9], 1 }
 0x292   :  { %372 = vsyncpa [#allocation4], 1 }

</bundles_post_ra>
